<compile_context>
chip_gen: v7x
topology: tpu7x:2x2x1
jax: 0.10.0
libtpu: 0.0.40
codegen_flags: <defaults>
</compile_context>

<pallas_src>
import jax
import jax.numpy as jnp
from jax import lax
from jax.experimental import pallas as pl
from jax.experimental.pallas import tpu as pltpu


_MAX_TILE_B = 8192   # beyond this, per-grid-step overhead (~0.35 us) is already <<1%
_MIN_SPLIT_B = 512   # batches at least this big get >=2 grid steps (v7x megacore sharding)


def _mlp_kernel(x_ref, w1_ref, b1_ref, w2_ref, b2_ref, o_ref):
    # Layer 1 on the MXU, "NT" form: (H, F) contracted with (TILE_B, F) on F
    # -> (H, TILE_B), f32 accumulation.  Batch ends up on the lane axis.
    h = lax.dot_general(
        w1_ref[...], x_ref[...],
        dimension_numbers=(((1,), (1,)), ((), ())),
        preferred_element_type=jnp.float32,
    )
    # Bias + ReLU in f32 on the VPU (b1 is an (H, 1) column, broadcast over lanes).
    h = jnp.maximum(h + b1_ref[...], 0.0)
    # Layer 2 (out_features == 1): VPU multiply + sublane reduction instead of an
    # N=1 MXU matmul.  Result (1, TILE_B) is lane-dense for the store.
    out = jnp.sum(h * w2_ref[...], axis=0, keepdims=True) + b2_ref[0, 0]
    o_ref[...] = out.astype(o_ref.dtype)


def _vmem_limit_bytes():
    """Per-generation scoped-VMEM limit (3/4 of physical per-TC VMEM, 64 MiB fallback = v7x)."""
    try:
        physical = pltpu.get_tpu_info().vmem_capacity_bytes
    except Exception:
        physical = 64 * 1024 * 1024
    return (3 * physical) // 4


def _pick_tile_b(b_rows, feat, x_bytes, hidden, vmem_limit):
    """Largest multiple-of-128 batch tile whose footprint fits half the scoped VMEM limit."""
    budget = vmem_limit // 2
    # per batch-row: double-buffered x block + double-buffered f32 out row + f32 hidden temps
    per_row = 2 * feat * x_bytes + 2 * 4 + 3 * hidden * 4
    tile = budget // max(per_row, 1)
    tile = int(min(tile, _MAX_TILE_B))
    b128 = -(-b_rows // 128) * 128
    if tile >= b128:
        if b_rows >= _MIN_SPLIT_B:
            # Keep >=2 grid steps so the "parallel" batch axis shards across both v7x TCs.
            half = -(-b_rows // 2)
            return -(-half // 128) * 128
        return b128
    return max(128, (tile // 128) * 128)


def net_forward(x, w1, b1, w2, b2, *, tile_b=None, use_bf16=True):
    """Forward pass of Net.

    x:  (B, F) float
    w1: (64, F), b1: (64,)   -- PyTorch nn.Linear (out, in) layout
    w2: (1, 64), b2: (1,)
    returns (B, 1) float32
    """
    B, F = x.shape
    H = w1.shape[0]
    assert w1.shape == (H, F)
    assert b1.shape == (H,)
    assert w2.shape == (1, H), "kernel assumes out_features == 1"
    assert b2.shape == (1,)

    # NOTE: default use_bf16=True intentionally quantizes x/w1 to bfloat16 (f32 accumulation);
    # pass use_bf16=False for closer parity with an f32 PyTorch nn.Linear.
    in_dtype = jnp.bfloat16 if use_bf16 else jnp.float32
    xq = x.astype(in_dtype)
    w1q = w1.astype(in_dtype)                      # (H, F): already the layout the kernel wants
    b1c = b1.astype(jnp.float32).reshape(H, 1)     # (H, 1)
    w2c = w2.astype(jnp.float32).reshape(H, 1)     # (H, 1)
    b2s = b2.astype(jnp.float32).reshape(1, 1)     # (1, 1) scalar -> SMEM

    vmem_limit = int(_vmem_limit_bytes())

    # --- batch tiling (no padding: ragged tail handled by Pallas partial-block masking) ----
    if tile_b is None:
        tile_b = _pick_tile_b(B, F, jnp.dtype(in_dtype).itemsize, H, vmem_limit)
    tile_b = int(tile_b)
    if tile_b % 128 != 0:
        raise ValueError("tile_b must be a multiple of 128")
    num_tiles = -(-B // tile_b)

    out_row = pl.pallas_call(
        _mlp_kernel,
        out_shape=jax.ShapeDtypeStruct((1, B), jnp.float32),
        grid=(num_tiles,),
        in_specs=[
            pl.BlockSpec((tile_b, F), lambda i: (i, 0)),              # x: streamed per tile
            pl.BlockSpec((H, F), lambda i: (0, 0)),                   # w1: resident
            pl.BlockSpec((H, 1), lambda i: (0, 0)),                   # b1: resident
            pl.BlockSpec((H, 1), lambda i: (0, 0)),                   # w2: resident
            pl.BlockSpec(memory_space=pltpu.MemorySpace.SMEM),        # b2: scalar in SMEM
        ],
        out_specs=pl.BlockSpec((1, tile_b), lambda i: (0, i)),        # lane-dense output row
        compiler_params=pltpu.CompilerParams(
            dimension_semantics=("parallel",),                        # megacore on v7x
            vmem_limit_bytes=vmem_limit,                              # back the larger tiles
        ),
    )(xq, w1q, b1c, w2c, b2s)

    return out_row.reshape(B, 1)


def init_params(key, in_features, hidden=64, out_features=1):
    """PyTorch-style init: uniform(-1/sqrt(fan_in), 1/sqrt(fan_in)), (out, in) weight layout."""
    k1, k2, k3, k4 = jax.random.split(key, 4)
    bound1 = 1.0 / jnp.sqrt(jnp.float32(in_features))
    bound2 = 1.0 / jnp.sqrt(jnp.float32(hidden))
    w1 = jax.random.uniform(k1, (hidden, in_features), jnp.float32, -bound1, bound1)
    b1 = jax.random.uniform(k2, (hidden,), jnp.float32, -bound1, bound1)
    w2 = jax.random.uniform(k3, (out_features, hidden), jnp.float32, -bound2, bound2)
    b2 = jax.random.uniform(k4, (out_features,), jnp.float32, -bound2, bound2)
    return w1, b1, w2, b2


if __name__ == "__main__":
    key = jax.random.PRNGKey(0)
    kx, kp = jax.random.split(key)

    batch, in_features = 500, 32                 # ragged batch exercises the masked tail
    x = jax.random.normal(kx, (batch, in_features), jnp.float32)
    w1, b1, w2, b2 = init_params(kp, in_features)

    # References (same math as nn.Sequential(Linear, ReLU, Linear)).
    def ref_fwd(xx, ww1):
        h = jnp.maximum(
            jnp.dot(xx, ww1.T, precision=lax.Precision.HIGHEST) + b1[None, :], 0.0)
        return jnp.sum(h * w2, axis=-1, keepdims=True) + b2[None, :]

    # (a) bf16 fast path, explicit 128-row tiles -> grid=(4,), partial tail tile masked in-kernel
    out_bf16 = jax.block_until_ready(net_forward(x, w1, b1, w2, b2, tile_b=128))
    # (b) f32 path, auto tile selection -> single 512-row block covering the ragged batch
    out_f32 = jax.block_until_ready(net_forward(x, w1, b1, w2, b2, use_bf16=False))

    xq = x.astype(jnp.bfloat16).astype(jnp.float32)
    w1q = w1.astype(jnp.bfloat16).astype(jnp.float32)
    ref_bf16 = ref_fwd(xq, w1q)
    ref_f32 = ref_fwd(x, w1)

    assert out_bf16.shape == (batch, 1) and out_f32.shape == (batch, 1)
    assert jnp.allclose(out_bf16, ref_bf16, atol=1e-3, rtol=1e-3), \
        float(jnp.max(jnp.abs(out_bf16 - ref_bf16)))
    assert jnp.allclose(out_f32, ref_f32, atol=1e-3, rtol=1e-3), \
        float(jnp.max(jnp.abs(out_f32 - ref_f32)))

    # (c) larger batch exercising the auto >=2-tile split (v7x megacore path; harmless on 1-TC chips)
    batch2 = 1536
    x2 = jax.random.normal(kx, (batch2, in_features), jnp.float32)
    out2 = jax.block_until_ready(net_forward(x2, w1, b1, w2, b2, use_bf16=False))
    ref2 = ref_fwd(x2, w1)
    assert out2.shape == (batch2, 1)
    assert jnp.allclose(out2, ref2, atol=1e-3, rtol=1e-3), \
        float(jnp.max(jnp.abs(out2 - ref2)))

    print("KERNEL_OK")
</pallas_src>

<mosaic_0001>
module attributes {stable_mosaic.version = 11 : i64} {
  func.func @_mlp_kernel(%arg0: i32, %arg1: memref<128x32xbf16, #tpu.memory_space<vmem>>, %arg2: memref<64x32xbf16, #tpu.memory_space<vmem>>, %arg3: memref<64x1xf32, #tpu.memory_space<vmem>>, %arg4: memref<64x1xf32, #tpu.memory_space<vmem>>, %arg5: memref<1x1xf32, #tpu.memory_space<smem>>, %arg6: memref<1x128xf32, #tpu.memory_space<vmem>>) attributes {dimension_semantics = [#tpu.dimension_semantics<parallel>], iteration_bounds = array<i64: 4>, scalar_prefetch = 0 : i64, scratch_operands = 0 : i64, tpu.core_type = #tpu.core_type<tc>, window_params = [{transform_indices = @transform_0, window_bounds = array<i64: 128, 32>}, {pipeline_mode = #tpu.pipeline_mode<synchronous>, transform_indices = @transform_1, window_bounds = array<i64: 64, 32>}, {pipeline_mode = #tpu.pipeline_mode<synchronous>, transform_indices = @transform_2, window_bounds = array<i64: 64, 1>}, {pipeline_mode = #tpu.pipeline_mode<synchronous>, transform_indices = @transform_3, window_bounds = array<i64: 64, 1>}, {transform_indices = @transform_4, window_bounds = array<i64: 1, 1>}, {transform_indices = @transform_5, window_bounds = array<i64: 1, 128>}]} {
    %c0 = arith.constant 0 : index
    %c0_0 = arith.constant 0 : index
    %0 = vector.load %arg2[%c0, %c0_0] : memref<64x32xbf16, #tpu.memory_space<vmem>>, vector<64x32xbf16>
    %c0_1 = arith.constant 0 : index
    %c0_2 = arith.constant 0 : index
    %1 = vector.load %arg1[%c0_1, %c0_2] : memref<128x32xbf16, #tpu.memory_space<vmem>>, vector<128x32xbf16>
    %cst = arith.constant dense<0.000000e+00> : vector<64x128xf32>
    %2 = tpu.matmul %0, %1, %cst {dimension_numbers = #tpu.dot_dimension_numbers<[1], [1], [0], [0], [0, 0, 1, 0], [], []>} : vector<64x32xbf16>, vector<128x32xbf16>, vector<64x128xf32> -> vector<64x128xf32>
    %c0_3 = arith.constant 0 : index
    %c0_4 = arith.constant 0 : index
    %3 = vector.load %arg3[%c0_3, %c0_4] : memref<64x1xf32, #tpu.memory_space<vmem>>, vector<64x1xf32>
    %4 = vector.broadcast %3 : vector<64x1xf32> to vector<64x128xf32>
    %5 = arith.addf %2, %4 : vector<64x128xf32>
    %cst_5 = arith.constant 0.000000e+00 : f32
    %6 = vector.broadcast %cst_5 : f32 to vector<64x128xf32>
    %7 = arith.maximumf %5, %6 : vector<64x128xf32>
    %c0_6 = arith.constant 0 : index
    %c0_7 = arith.constant 0 : index
    %8 = vector.load %arg4[%c0_6, %c0_7] : memref<64x1xf32, #tpu.memory_space<vmem>>, vector<64x1xf32>
    %9 = vector.broadcast %8 : vector<64x1xf32> to vector<64x128xf32>
    %10 = arith.mulf %7, %9 : vector<64x128xf32>
    %cst_8 = arith.constant dense<0.000000e+00> : vector<128xf32>
    %11 = vector.multi_reduction <add>, %10, %cst_8 [0] : vector<64x128xf32> to vector<128xf32>
    %12 = vector.shape_cast %11 : vector<128xf32> to vector<1x128xf32>
    %c0_9 = arith.constant 0 : index
    %c0_10 = arith.constant 0 : index
    %13 = memref.load %arg5[%c0_9, %c0_10] : memref<1x1xf32, #tpu.memory_space<smem>>
    %14 = vector.broadcast %13 : f32 to vector<1x128xf32>
    %15 = arith.addf %12, %14 : vector<1x128xf32>
    %c0_11 = arith.constant 0 : index
    %c0_12 = arith.constant 0 : index
    %16 = vector.load %arg6[%c0_11, %c0_12] : memref<1x128xf32, #tpu.memory_space<vmem>>, vector<1x128xf32>
    tpu.vector_store %arg6[%c0_11, %c0_12], %15 {strides = array<i32>} : memref<1x128xf32, #tpu.memory_space<vmem>>, vector<1x128xf32>,
    return
  }
  func.func @transform_0(%arg0: i32) -> (i32, i32) {
    %c0_i32 = arith.constant 0 : i32
    %c0_i32_0 = arith.constant 0 : i32
    return %arg0, %c0_i32 : i32, i32
  }
  func.func @transform_1(%arg0: i32) -> (i32, i32) {
    %c0_i32 = arith.constant 0 : i32
    %c0_i32_0 = arith.constant 0 : i32
    %c0_i32_1 = arith.constant 0 : i32
    return %c0_i32, %c0_i32_0 : i32, i32
  }
  func.func @transform_2(%arg0: i32) -> (i32, i32) {
    %c0_i32 = arith.constant 0 : i32
    %c0_i32_0 = arith.constant 0 : i32
    %c0_i32_1 = arith.constant 0 : i32
    return %c0_i32, %c0_i32_0 : i32, i32
  }
  func.func @transform_3(%arg0: i32) -> (i32, i32) {
    %c0_i32 = arith.constant 0 : i32
    %c0_i32_0 = arith.constant 0 : i32
    %c0_i32_1 = arith.constant 0 : i32
    return %c0_i32, %c0_i32_0 : i32, i32
  }
  func.func @transform_4(%arg0: i32) -> (i32, i32) {
    %c0_i32 = arith.constant 0 : i32
    %c0_i32_0 = arith.constant 0 : i32
    %c0_i32_1 = arith.constant 0 : i32
    return %c0_i32, %c0_i32_0 : i32, i32
  }
  func.func @transform_5(%arg0: i32) -> (i32, i32) {
    %c0_i32 = arith.constant 0 : i32
    %c0_i32_0 = arith.constant 0 : i32
    return %c0_i32, %arg0 : i32, i32
  }
}

</mosaic_0001>

<bundles_post_ra>
// kernel: tpu_custom_call.1
= control target key start
LH: loop header
LB: loop body
LE: loop exit
PB: predicated region body
PF: predicated region fallthrough
CT: control target
= control target key end

     0   :  { %s1072_s0 = inlined_call_operand.vmem [shape: bf16[500,32], index: 0, kind: input, shape index: {}]   ;;  %s1073_s1 = inlined_call_operand.vmem [shape: bf16[64,32], index: 1, kind: input, shape index: {}]   ;;  %s1074_s2 = inlined_call_operand.vmem [shape: f32[64,1], index: 2, kind: input, shape index: {}]   ;;  %s1075_s3 = inlined_call_operand.vmem [shape: f32[64,1], index: 3, kind: input, shape index: {}]   ;;  %s1076_s4 = inlined_call_operand.<no memory space> [shape: f32[1,1], index: 4, kind: input, shape index: {}]   ;;  %s1077_s5 = inlined_call_operand.hbm [shape: f32[1,500], index: 5, kind: output, shape index: {}]  }
   0x1   :  { %10 = sst [smem:[#allocation2]] %s1076_s4 }
   0x2   :  { %11 = vsyncpa [#allocation4], 0 }
   0x3   :  { %13 = vsyncpa [#allocation4 + $0x1], 0  ;;  %s875_s20 = smov 0   ;;  %s877_s21 = smov 0  }
   0x4   :  { %s879_s22 = smov 0   ;;  %s881_s23 = smov 0  }
   0x5 LB: > { %s628_s4 = sadd.s32 4294967295, %s838_s23   ;;  %s629_s24 = sadd.s32 4294967294, %s838_s23   ;;  %s838_s23 = sphi %s881_s23, %s1083_s23   ;;  %s834_s22 = sphi %s879_s22, %s1082_s22   ;;  %s830_s21 = sphi %s877_s21, %s1081_s21   ;;  %s826_s20 = sphi %s875_s20, %s1080_s20  }
   0x6   : > { %s898_s25 = sadd.s32 1, %s838_s23   ;;  %s136_s26 = sadd.s32 1, %s834_s22 }
   0x7   : > { %s133_s27 = ssub.s32 %s838_s23, %s898_s25  ;;  %p146_p0 = scmp.ne.s32.totalorder %s834_s22, %s830_s21 }
   0x8   : > { %p134_p1 = scmp.eq.s32.totalorder %s133_s27, 0  ;;  %p147_p2 = scmp.eq.s32.totalorder %s628_s4, 3 }
   0x9   : > { %p152_p3 = scmp.ne.s32.totalorder %s830_s21, %s826_s20  ;;  %p153_p4 = scmp.eq.s32.totalorder %s629_s24, 3 }
   0xa   : > { %s908_s28 = scalar_select %p134_p1, %s834_s22, %s136_s26  }
   0xb   : > { %p910_p5 = por %p147_p2, %p146_p0  ;;  %p914_p6 = por %p153_p4, %p152_p3 }
   0xc   : > { %p632_p7 = scmp.ge.s32.totalorder %s838_s23, 1  ;;  %p200_p8 = scmp.lt.s32.totalorder %s838_s23, 5 }
   0xe   : > { %p201_p9 = pnand %p632_p7, %p200_p8 }
   0xf   : > { %s920_s6 = sshll.u32 (!%p201_p9), %s628_s4, 4  ;;  %vm378_vm0 = vcmask (!%p201_p9), 261120   ;;  %v772_v0 = vld [vmem:[%s1073_s1] sm:$0xff] (!%p201_p9)   ;;  %v773_v1 = vld [vmem:[%s1073_s1 + $0x10] sm:$0xff] (!%p201_p9)   ;;  %v840_v2 = vmov (!%p201_p9), 0   ;;  %v271_v6 = vld [vmem:[%s1074_s2 + $0x8] sm:$0xff] (!%p201_p9) }
  0x10   : > { %204 = sbr.rel (%p201_p9) target bundleno = 355 (0x163), region = 40  ;;  %p236_p10 = scmp.lt.s32.totalorder (!%p201_p9), %s920_s6, 62  ;;  %682 = vmatprep.mubr.msk.bf16.mxu0 (!%p201_p9), %vm378_vm0, %v772_v0  ;;  %762 = vset.pattern.permute.xlu0 (!%p201_p9), %v840_v2  ;;  %v270_v3 = vld [vmem:[%s1074_s2] sm:$0xff] (!%p201_p9)  ;;  %v272_v4 = vld [vmem:[%s1074_s2 + $0x10] sm:$0xff] (!%p201_p9)  ;;  %v273_v9 = vld [vmem:[%s1074_s2 + $0x18] sm:$0xff] (!%p201_p9) }
  0x11   : > { %686 = vmatprep.mubr.msk.bf16.mxu1 (!%p201_p9), %vm378_vm0, %v773_v1  ;;  %763 = vset.pattern.permute.xlu1 (!%p201_p9), %v840_v2  ;;  %v488_v10 = vld [vmem:[%s1075_s3] sm:$0xff] (!%p201_p9)  ;;  %v489_v11 = vld [vmem:[%s1075_s3 + $0x8] sm:$0xff] (!%p201_p9)  ;;  %v490_v15 = vld [vmem:[%s1075_s3 + $0x10] sm:$0xff] (!%p201_p9)  ;;  %s229_s4 = sand.u32 (!%p201_p9), 1, %s830_s21   ;;  %s1030_s8 = scalar_lea.hbm (!%p201_p9), %s1077_s5, %s920_s6 }
  0x12   : > { %280 = vperm.xlu0 (!%p201_p9), %762, %v270_v3   ;;  %290 = vperm.xlu1 (!%p201_p9), %763, %v272_v4   ;;  %v274_v14 = vld [vmem:[%s1074_s2 + $0x20] sm:$0xff] (!%p201_p9)  ;;  %v275_v16 = vld [vmem:[%s1074_s2 + $0x28] sm:$0xff] (!%p201_p9)  ;;  %v491_v17 = vld [vmem:[%s1075_s3 + $0x18] sm:$0xff] (!%p201_p9)  ;;  %s230_s24 = scalar_lea.vmem (!%p201_p9), [#allocation3], %s229_s4  ;;  %s562_s9 = scalar_lea.sflag (!%p201_p9), [#allocation4], %s229_s4 }
  0x13   : > { %v276_v20 = vld [vmem:[%s1074_s2 + $0x30] sm:$0xff] (!%p201_p9)  ;;  %v492_v21 = vld [vmem:[%s1075_s3 + $0x20] sm:$0xff] (!%p201_p9)  ;;  %v277_v22 = vld [vmem:[%s1074_s2 + $0x38] sm:$0xff] (!%p201_p9)  ;;  %s574_s26 = sshll.u32 (!%p201_p9), %s230_s24, 4  ;;  %s1032_s26 = int_to_ptr.vmem [resolvable:$true] %s574_s26 }
  0x14   : > { %v493_v23 = vld [vmem:[%s1075_s3 + $0x28] sm:$0xff] (!%p201_p9)  ;;  %v494_v26 = vld [vmem:[%s1075_s3 + $0x30] sm:$0xff] (!%p201_p9)  ;;  %v495_v27 = vld [vmem:[%s1075_s3 + $0x38] sm:$0xff] (!%p201_p9)  ;;  %s776_s10 = scalar_lea.vmem (!%p201_p9), %s1032_s26, 16 }
  0x15   : > { %v774_v35 = vld [vmem:[%s1073_s1 + $0x8] sm:$0xff] (!%p201_p9)   ;;  %v775_v36 = vld [vmem:[%s1073_s1 + $0x18] sm:$0xff] (!%p201_p9)   ;;  %p777_p11 = scmp.ne.s32.totalorder (!%p201_p9), %s1032_s26, %s776_s10 }
  0x16   : > { %285 = vperm.xlu0 (!%p201_p9), %762, %v271_v6   ;;  %295 = vperm.xlu1 (!%p201_p9), %763, %v273_v9  }
  0x17   : > { %s237_s11 = scalar_select %p236_p10, %s920_s6, 62 }
  0x18   : > { %p778_p12 = pnand %p777_p11, %p910_p5 }
  0x19   : > { %s634_s16 = sshll.u32 %s237_s11, 2  ;;  %s841_s11 = smov [#allocation3]  }
  0x1a   : > { %s941_s19 = scalar_lea.vmem %s1072_s0, %s634_s16  ;;  %498 = vperm.xlu0 %762, %v488_v10   ;;  %503 = vperm.xlu1 %763, %v489_v11   ;;  %p779_p13 = pneg %p778_p12 }
  0x1b   : > { %v764_v5 = vld [vmem:[%s941_s19] sm:$0xff]   ;;  %v765_v7 = vld [vmem:[%s941_s19 + $0x8] sm:$0xff]   ;;  %v766_v13 = vld [vmem:[%s941_s19 + $0x10] sm:$0xff]   ;;  %s780_s12 = sshll.u32 %s841_s11, 4  ;;  %s781_s12 = int_to_ptr.vmem [resolvable:$false] %s780_s12 }
  0x1c   : > { %706 = vmatprep.subr.msk.bf16.mxu0 %vm378_vm0, %v764_v5  ;;  %707 = vmatprep.subr.msk.bf16.mxu1 %vm378_vm0, %v764_v5  ;;  %v392_v8 = vsel %vm378_vm0, %v764_v5, 0  ;;  %v395_v12 = vsel %vm378_vm0, %v765_v7, 0  ;;  %v398_v18 = vsel %vm378_vm0, %v766_v13, 0  ;;  %v767_v19 = vld [vmem:[%s941_s19 + $0x18] sm:$0xff]   ;;  %v768_v25 = vld [vmem:[%s941_s19 + $0x20] sm:$0xff]   ;;  %v769_v29 = vld [vmem:[%s941_s19 + $0x28] sm:$0xff]   ;;  %p783_p0 = scmp.lt.s32.totalorder %s1032_s26, %s781_s12 }
  0x1d   : > { %667 = vmatpush3.bf16.xpose.msra.mxu0 %v392_v8  ;;  %698 = vmatpush3.bf16.xpose.msra.mxu1 %v392_v8  ;;  %v401_v24 = vsel %vm378_vm0, %v767_v19, 0  ;;  %v404_v28 = vsel %vm378_vm0, %v768_v25, 0  ;;  %v407_v30 = vsel %vm378_vm0, %v769_v29, 0  ;;  %v770_v31 = vld [vmem:[%s941_s19 + $0x30] sm:$0xff]   ;;  %v771_v33 = vld [vmem:[%s941_s19 + $0x38] sm:$0xff]   ;;  %s557_s19 = sld [smem:[#allocation2]] }
  0x1e   : > { %708 = vmatprep.subr.msk.bf16.mxu0 %vm378_vm0, %v765_v7  ;;  %709 = vmatprep.subr.msk.bf16.mxu1 %vm378_vm0, %v765_v7  ;;  %v410_v32 = vsel %vm378_vm0, %v770_v31, 0  ;;  %v413_v34 = vsel %vm378_vm0, %v771_v33, 0  ;;  %s782_s13 = scalar_lea.vmem %s781_s12, 32 }
  0x1f   : > { %300 = vperm.xlu0 %762, %v274_v14   ;;  %508 = vperm.xlu1 %763, %v490_v15   ;;  %p784_p1 = scmp.lt.s32.totalorder %s782_s13, %s776_s10 }
  0x21   : > { %p785_p2 = por %p784_p1, %p783_p0 }
  0x23   : > { %305 = vperm.xlu0 %762, %v275_v16   ;;  %513 = vperm.xlu1 %763, %v491_v17   ;;  %p786_p3 = pnand %p785_p2, %p779_p13 }
  0x25   : > { %669 = vmatpush3.bf16.xpose.msra.mxu0 %v395_v12  ;;  %699 = vmatpush3.bf16.xpose.msra.mxu1 %v395_v12 }
  0x26   : > { %710 = vmatprep.subr.msk.bf16.mxu0 %vm378_vm0, %v766_v13  ;;  %711 = vmatprep.subr.msk.bf16.mxu1 %vm378_vm0, %v766_v13 }
  0x27   : > { %310 = vperm.xlu0 %762, %v276_v20   ;;  %518 = vperm.xlu1 %763, %v492_v21  }
  0x2b   : > { %315 = vperm.xlu0 %762, %v277_v22   ;;  %523 = vperm.xlu1 %763, %v493_v23  }
  0x2d   : > { %671 = vmatpush3.bf16.xpose.msra.mxu0 %v398_v18  ;;  %700 = vmatpush3.bf16.xpose.msra.mxu1 %v398_v18 }
  0x2e   : > { %712 = vmatprep.subr.msk.bf16.mxu0 %vm378_vm0, %v767_v19  ;;  %713 = vmatprep.subr.msk.bf16.mxu1 %vm378_vm0, %v767_v19 }
  0x2f   : > { %528 = vperm.xlu0 %762, %v494_v26   ;;  %533 = vperm.xlu1 %763, %v495_v27  }
  0x35   : > { %673 = vmatpush3.bf16.xpose.msra.mxu0 %v401_v24  ;;  %701 = vmatpush3.bf16.xpose.msra.mxu1 %v401_v24 }
  0x36   : > { %714 = vmatprep.subr.msk.bf16.mxu0 %vm378_vm0, %v768_v25  ;;  %715 = vmatprep.subr.msk.bf16.mxu1 %vm378_vm0, %v768_v25 }
  0x3d   : > { %675 = vmatpush3.bf16.xpose.msra.mxu0 %v404_v28  ;;  %702 = vmatpush3.bf16.xpose.msra.mxu1 %v404_v28 }
  0x3e   : > { %716 = vmatprep.subr.msk.bf16.mxu0 %vm378_vm0, %v769_v29  ;;  %717 = vmatprep.subr.msk.bf16.mxu1 %vm378_vm0, %v769_v29 }
  0x45   : > { %677 = vmatpush3.bf16.xpose.msra.mxu0 %v407_v30  ;;  %703 = vmatpush3.bf16.xpose.msra.mxu1 %v407_v30 }
  0x46   : > { %718 = vmatprep.subr.msk.bf16.mxu0 %vm378_vm0, %v770_v31  ;;  %719 = vmatprep.subr.msk.bf16.mxu1 %vm378_vm0, %v770_v31 }
  0x4d   : > { %679 = vmatpush3.bf16.xpose.msra.mxu0 %v410_v32  ;;  %704 = vmatpush3.bf16.xpose.msra.mxu1 %v410_v32 }
  0x4e   : > { %720 = vmatprep.subr.msk.bf16.mxu0 %vm378_vm0, %v771_v33  ;;  %721 = vmatprep.subr.msk.bf16.mxu1 %vm378_vm0, %v771_v33  ;;  %v558_v33 = vstv %s557_s19 }
  0x55   : > { %681 = vmatpush3.bf16.xpose.msra.mxu0 %v413_v34  ;;  %705 = vmatpush3.bf16.xpose.msra.mxu1 %v413_v34 }
  0x5c   : > { %683 = vmatmul.mubr.msk.bf16.vlgmr.msra.gmra.mrb[0].mxu0 %vm378_vm0, %v774_v35  ;;  %687 = vmatmul.mubr.msk.bf16.vlgmr.msra.gmra.mrb[0].mxu1 %vm378_vm0, %v775_v36 }
  0x91   : > { %v281_v37 = vpop.permute.xlu0 %280  ;;  %v291_v38 = vpop.permute.xlu1 %290 }
  0x95   : > { %v286_v39 = vpop.permute.xlu0 %285  ;;  %v296_v40 = vpop.permute.xlu1 %295 }
  0x99   : > { %v499_v41 = vpop.permute.xlu0 %498  ;;  %v504_v42 = vpop.permute.xlu1 %503 }
  0x9e   : > { %v301_v43 = vpop.permute.xlu0 %300  ;;  %v509_v44 = vpop.permute.xlu1 %508 }
  0xa2   : > { %v306_v45 = vpop.permute.xlu0 %305  ;;  %v514_v46 = vpop.permute.xlu1 %513 }
  0xa6   : > { %v311_v60 = vpop.permute.xlu0 %310  ;;  %v519_v0 = vpop.permute.xlu1 %518 }
  0xaa   : > { %v316_v9 = vpop.permute.xlu0 %315  ;;  %v524_v14 = vpop.permute.xlu1 %523 }
  0xae   : > { %v529_v21 = vpop.permute.xlu0 %528  ;;  %v534_v24 = vpop.permute.xlu1 %533 }
 0x12f   : > { %v684_v47 = vpop.f32.mrb[0].mxu0  ;;  %v688_v48 = vpop.f32.mrb[0].mxu1 }
 0x130   : > { %v449_v49 = vpop.f32.mrb[1].mxu0  ;;  %v465_v50 = vpop.f32.mrb[1].mxu1  ;;  %v458_v51 = vadd.f32 %v684_v47, %v291_v38  ;;  %v474_v6 = vadd.f32 %v688_v48, %v311_v60 }
 0x131   : > { %v450_v52 = vadd.f32 %v449_v49, %v281_v37  ;;  %v685_v53 = vpop.f32.mrb[2].mxu0  ;;  %v689_v54 = vpop.f32.mrb[2].mxu1  ;;  %v466_v62 = vadd.f32 %v465_v50, %v301_v43 }
 0x132   : > { %v452_v55 = vpop.f32.mrb[3].mxu0  ;;  %v468_v56 = vpop.f32.mrb[3].mxu1  ;;  %v461_v58 = vadd.f32 %v685_v53, %v296_v40  ;;  %v482_v61 = vmax.f32 %v458_v51, 0.0  ;;  %v477_v11 = vadd.f32 %v689_v54, %v316_v9  ;;  %v486_v15 = vmax.f32 %v474_v6, 0.0 }
 0x133   : > { %v480_v57 = vmax.f32 %v450_v52, 0.0  ;;  %v453_v59 = vadd.f32 %v452_v55, %v286_v39  ;;  %v469_v4 = vadd.f32 %v468_v56, %v306_v45  ;;  %v484_v7 = vmax.f32 %v466_v62, 0.0 }
 0x134   : > { %v483_v2 = vmax.f32 %v461_v58, 0.0  ;;  %v538_v5 = vmul.f32 %v509_v44, %v482_v61  ;;  %v487_v18 = vmax.f32 %v477_v11, 0.0  ;;  %v542_v22 = vmul.f32 %v529_v21, %v486_v15 }
 0x135   : > { %v481_v63 = vmax.f32 %v453_v59, 0.0  ;;  %v536_v1 = vmul.f32 %v499_v41, %v480_v57  ;;  %v485_v13 = vmax.f32 %v469_v4, 0.0  ;;  %v540_v16 = vmul.f32 %v519_v0, %v484_v7 }
 0x136   : > { %v539_v10 = vmul.f32 %v514_v46, %v483_v2  ;;  %v543_v25 = vmul.f32 %v534_v24, %v487_v18 }
 0x137   : > { %v537_v3 = vmul.f32 %v504_v42, %v481_v63  ;;  %v541_v19 = vmul.f32 %v524_v14, %v485_v13 }
 0x139   : > { %v544_v8 = vadd.f32 %v537_v3, %v536_v1 }
 0x13b   : > { %v545_v12 = vadd.f32 %v544_v8, %v538_v5 }
 0x13d   : > { %v546_v17 = vadd.f32 %v545_v12, %v539_v10 }
 0x13f   : > { %v547_v20 = vadd.f32 %v546_v17, %v540_v16 }
 0x141   : > { %v548_v23 = vadd.f32 %v547_v20, %v541_v19 }
 0x143   : > { %v549_v26 = vadd.f32 %v548_v23, %v542_v22 }
 0x145   : > { %v550_v27 = vadd.f32 %v549_v26, %v543_v25 }
 0x147   : > { %v551_v28 = vrot.slane %v550_v27, 4 }
 0x149   : > { %v552_v29 = vadd.f32 %v551_v28, %v550_v27 }
 0x14b   : > { %v553_v30 = vrot.slane %v552_v29, 2 }
 0x14d   : > { %v554_v31 = vadd.f32 %v553_v30, %v552_v29 }
 0x14f   : > { %v555_v32 = vrot.slane %v554_v31, 1 }
 0x151   : > { %v556_v34 = vadd.f32 %v555_v32, %v554_v31 }
 0x153   : > { %v559_v35 = vadd.f32 %v558_v33, %v556_v34 }
 0x155   : > { %560 = vst [vmem:[%s230_s24] sm:$0x1] %v559_v35 }
 0x156   : > { %789 = shalt.err (!%p786_p3)
}
 0x157   : > { %s790_s6 = scalar_lea.hbm %s1030_s8, 16  ;;  %s794_s16 = scalar_lea.hbm %s1077_s5, 64 }
 0x158   : > { %p791_p4 = scmp.ne.s32.totalorder %s1030_s8, %s790_s6  ;;  %p795_p9 = scmp.lt.u32.totalorder %s1030_s8, %s1077_s5 }
 0x159   : > { %p796_p10 = scmp.lt.u32.totalorder %s794_s16, %s790_s6  ;;  %p798_p12 = scmp.lt.u32.totalorder %s790_s6, %s1030_s8 }
 0x15a   : > { %p792_p7 = pnand %p791_p4, %p910_p5 }
 0x15b   : > { %p797_p11 = por %p796_p10, %p795_p9 }
 0x15c   : > { %p793_p8 = pneg %p792_p7 }
 0x15d   : > { %p799_p13 = por %p798_p12, %p797_p11 }
 0x15f   : > { %p800_p0 = pnand %p799_p13, %p793_p8 }
 0x161   : > { %803 = shalt.err (!%p800_p0)
}
 0x162   : > { %722 = dma.vmem_to_hbm [thread:$0]  (%p910_p5), %s1032_s26, 16, %s1030_s8, %s562_s9  }
 0x163 PF: > { %p728_p1 = scmp.ge.s32.totalorder %s838_s23, 2  ;;  %s586_s19 = sand.u32 1, %s826_s20  }
 0x164   : > { %s587_s4 = scalar_lea.sflag [#allocation4], %s586_s19 }
 0x165   : > { %p725_p2 = pnand %p728_p1, %p914_p6 }
 0x167   : > { %821 = dma.done.wait (!%p725_p2), %s587_s4, 16  }
 0x168   : > { %823 = vsyncadd (!%p725_p2), %s587_s4, 4294967280  ;;  %p16_p3 = scmp.ge.s32.totalorder %s898_s25, 6   ;;  %s1080_s20 = smov %s830_s21 }
 0x169   : > { %s1081_s21 = smov %s834_s22  ;;  %s1082_s22 = smov %s908_s28 }
 0x16a   : > { %s1083_s23 = smov %s898_s25  ;;  %18 = sbr.rel (!%p16_p3) target bundleno = 5 (0x5), region = 75 }
 0x171   :  { %591 = vsyncpa [#allocation4], 1 }
 0x172   :  { %593 = vsyncpa [#allocation4 + $0x1], 1 }

</bundles_post_ra>
